<compile_context>
chip_gen: v6e
topology: v6e:2x2x1
jax: 0.10.0
libtpu: 0.0.40
codegen_flags: <defaults>
</compile_context>

<pallas_src>
import jax
import jax.numpy as jnp
from jax.experimental import pallas as pl
from jax.experimental.pallas import tpu as pltpu

LATENT_DIM = 32
C_FEAT = 512
H = 8
W = 8
N_PIX = H * W                     # 64 spatial positions
FC_OUT = C_FEAT * N_PIX           # 32768, hard-coded in the module
C_OUT = 3                         # stand-in decoder output channels
OUT_COLS = C_OUT * N_PIX          # 192 useful output columns, NCHW-flat (k*64 + hw)
OUT_COLS_PAD = 256                # padded to a lane-dense 2x128 slab
MAX_TILE_B = 256                  # batch tile for production batch sizes


# ---------------------------------------------------------------------------
# Fused kernel: one f32 MXU matmul against the folded (fc_z o decoder) weight,
# bias add, tanh, lane-dense 256-wide store.
# ---------------------------------------------------------------------------
def _fused_generator_kernel(z_ref, w_ref, b_ref, o_ref):
    y = (
        jnp.dot(z_ref[...], w_ref[...], preferred_element_type=jnp.float32)
        + b_ref[...]
    )                              # (TILE_B, 256) f32; cols >= 192 are zero
    o_ref[...] = jnp.tanh(y)


def generator_pallas(z, w_comb, b_comb):
    """z: (B, L) f32.  Returns (B, OUT_COLS_PAD) f32 NCHW-flat padded image slab."""
    B, L = z.shape
    if B <= MAX_TILE_B:
        tile_b, b_pad = B, B
    else:
        tile_b = MAX_TILE_B
        b_pad = pl.cdiv(B, tile_b) * tile_b
    if b_pad != B:
        z = jnp.pad(z, ((0, b_pad - B), (0, 0)))

    out = pl.pallas_call(
        _fused_generator_kernel,
        out_shape=jax.ShapeDtypeStruct((b_pad, OUT_COLS_PAD), jnp.float32),
        grid_spec=pltpu.PrefetchScalarGridSpec(
            num_scalar_prefetch=0,
            grid=(b_pad // tile_b,),
            in_specs=[
                pl.BlockSpec((tile_b, L), lambda i: (i, 0)),          # z batch tile
                pl.BlockSpec((L, OUT_COLS_PAD), lambda i: (0, 0)),    # folded weight (resident)
                pl.BlockSpec((1, OUT_COLS_PAD), lambda i: (0, 0)),    # folded bias (resident)
            ],
            out_specs=pl.BlockSpec((tile_b, OUT_COLS_PAD), lambda i: (i, 0)),
        ),
        compiler_params=pltpu.CompilerParams(
            dimension_semantics=("parallel",),
        ),
    )(z, w_comb, b_comb)
    return out[:B]


# ---------------------------------------------------------------------------
# Parameter init (PyTorch-equivalent layout, f32) and one-time offline fold of
# fc_z with the linear stand-in decoder (NCHW-flat output columns, padded).
# ---------------------------------------------------------------------------
def init_params(key):
    k1, k2, k3, k4 = jax.random.split(key, 4)
    k_fc = 1.0 / jnp.sqrt(LATENT_DIM)
    fc_w = jax.random.uniform(k1, (LATENT_DIM, FC_OUT), jnp.float32, -k_fc, k_fc)
    fc_b = jax.random.uniform(k2, (FC_OUT,), jnp.float32, -k_fc, k_fc)
    k_dec = 1.0 / jnp.sqrt(float(C_FEAT))
    dec_w = jax.random.uniform(k3, (C_FEAT, C_OUT), jnp.float32, -k_dec, k_dec)
    dec_b = jax.random.uniform(k4, (C_OUT,), jnp.float32, -k_dec, k_dec)
    return fc_w, fc_b, dec_w, dec_b


def prepare_params(raw):
    """One-time offline fold:  decoder(view(fc_z(z)))  ==  tanh(z @ W_comb + b_comb).

    fc_w columns are indexed c*64 + hw (NCHW view).  Output columns are ordered
    NCHW-flat: out_col = k*64 + h*8 + w, padded 192 -> 256 for a lane-dense store.
    """
    fc_w, fc_b, dec_w, dec_b = raw
    fc_w3 = fc_w.reshape(LATENT_DIM, C_FEAT, N_PIX)                 # (L, c, hw)
    w_comb = jnp.einsum("lcp,ck->lkp", fc_w3, dec_w).reshape(LATENT_DIM, OUT_COLS)
    fc_b2 = fc_b.reshape(C_FEAT, N_PIX)                             # (c, hw)
    b_comb = (jnp.einsum("cp,ck->kp", fc_b2, dec_w) + dec_b[:, None]).reshape(OUT_COLS)

    w_pad = jnp.zeros((LATENT_DIM, OUT_COLS_PAD), jnp.float32).at[:, :OUT_COLS].set(w_comb)
    b_pad = jnp.zeros((1, OUT_COLS_PAD), jnp.float32).at[:, :OUT_COLS].set(b_comb[None, :])
    return w_pad, b_pad


# ---------------------------------------------------------------------------
# VAEGenerator.forward(batch_size)
# ---------------------------------------------------------------------------
def vae_generator_forward(key, batch_size, prepared):
    w_comb, b_comb = prepared
    # Single RNG dispatch for both z and the 0.1-scaled noise.
    n = jax.random.normal(key, (2, batch_size, LATENT_DIM), jnp.float32)
    z = n[0] + 0.1 * n[1]
    out = generator_pallas(z, w_comb, b_comb)                       # (B, 256)
    fake_images = out[:, :OUT_COLS].reshape(batch_size, C_OUT, H, W)  # NCHW, no transpose
    return fake_images, z


if __name__ == "__main__":
    batch_size = 2
    root_key = jax.random.PRNGKey(0)
    param_key, fwd_key = jax.random.split(root_key)

    raw_params = init_params(param_key)
    prepared = prepare_params(raw_params)

    fwd = jax.jit(vae_generator_forward, static_argnums=(1,))
    fake_images, z_used = fwd(fwd_key, batch_size, prepared)
    fake_images = jax.block_until_ready(fake_images)

    # Shape / dtype / range checks.
    assert fake_images.shape == (batch_size, C_OUT, H, W)
    assert fake_images.dtype == jnp.float32
    assert bool(jnp.all(jnp.isfinite(fake_images)))
    assert bool(jnp.all(jnp.abs(fake_images) <= 1.0))   # tanh output range

    # Pure-JAX f32 reference through the ORIGINAL two-stage path (un-folded weights).
    fc_w, fc_b, dec_w, dec_b = raw_params
    ref_feat = (z_used @ fc_w + fc_b).reshape(batch_size, C_FEAT, H, W)
    ref_images = jnp.tanh(
        jnp.einsum("bchw,ck->bkhw", ref_feat, dec_w) + dec_b[None, :, None, None]
    )
    assert bool(jnp.allclose(fake_images, ref_images, atol=1e-2, rtol=0.0))

    print("KERNEL_OK")
</pallas_src>

<mosaic_0001>
module attributes {stable_mosaic.version = 11 : i64} {
  func.func @_fused_generator_kernel(%arg0: i32, %arg1: memref<2x32xf32, #tpu.memory_space<vmem>>, %arg2: memref<32x256xf32, #tpu.memory_space<vmem>>, %arg3: memref<1x256xf32, #tpu.memory_space<vmem>>, %arg4: memref<2x256xf32, #tpu.memory_space<vmem>>) attributes {dimension_semantics = [#tpu.dimension_semantics<parallel>], iteration_bounds = array<i64: 1>, scalar_prefetch = 0 : i64, scratch_operands = 0 : i64, tpu.core_type = #tpu.core_type<tc>, window_params = [{transform_indices = @transform_0, window_bounds = array<i64: 2, 32>}, {pipeline_mode = #tpu.pipeline_mode<synchronous>, transform_indices = @transform_1, window_bounds = array<i64: 32, 256>}, {pipeline_mode = #tpu.pipeline_mode<synchronous>, transform_indices = @transform_2, window_bounds = array<i64: 1, 256>}, {transform_indices = @transform_3, window_bounds = array<i64: 2, 256>}]} {
    %c0 = arith.constant 0 : index
    %c0_0 = arith.constant 0 : index
    %0 = vector.load %arg1[%c0, %c0_0] : memref<2x32xf32, #tpu.memory_space<vmem>>, vector<2x32xf32>
    %c0_1 = arith.constant 0 : index
    %c0_2 = arith.constant 0 : index
    %1 = vector.load %arg2[%c0_1, %c0_2] : memref<32x256xf32, #tpu.memory_space<vmem>>, vector<32x256xf32>
    %cst = arith.constant dense<0.000000e+00> : vector<2x256xf32>
    %2 = tpu.matmul %0, %1, %cst {dimension_numbers = #tpu.dot_dimension_numbers<[1], [0], [0], [1], [0, 0, 1, 1], [], []>} : vector<2x32xf32>, vector<32x256xf32>, vector<2x256xf32> -> vector<2x256xf32>
    %c0_3 = arith.constant 0 : index
    %c0_4 = arith.constant 0 : index
    %3 = vector.load %arg3[%c0_3, %c0_4] : memref<1x256xf32, #tpu.memory_space<vmem>>, vector<1x256xf32>
    %4 = vector.broadcast %3 : vector<1x256xf32> to vector<2x256xf32>
    %5 = arith.addf %2, %4 : vector<2x256xf32>
    %6 = math.tanh %5 : vector<2x256xf32>
    %c0_5 = arith.constant 0 : index
    %c0_6 = arith.constant 0 : index
    %7 = vector.load %arg4[%c0_5, %c0_6] : memref<2x256xf32, #tpu.memory_space<vmem>>, vector<2x256xf32>
    tpu.vector_store %arg4[%c0_5, %c0_6], %6 {strides = array<i32>} : memref<2x256xf32, #tpu.memory_space<vmem>>, vector<2x256xf32>,
    return
  }
  func.func @transform_0(%arg0: i32) -> (i32, i32) {
    %c0_i32 = arith.constant 0 : i32
    %c0_i32_0 = arith.constant 0 : i32
    return %arg0, %c0_i32 : i32, i32
  }
  func.func @transform_1(%arg0: i32) -> (i32, i32) {
    %c0_i32 = arith.constant 0 : i32
    %c0_i32_0 = arith.constant 0 : i32
    %c0_i32_1 = arith.constant 0 : i32
    return %c0_i32, %c0_i32_0 : i32, i32
  }
  func.func @transform_2(%arg0: i32) -> (i32, i32) {
    %c0_i32 = arith.constant 0 : i32
    %c0_i32_0 = arith.constant 0 : i32
    %c0_i32_1 = arith.constant 0 : i32
    return %c0_i32, %c0_i32_0 : i32, i32
  }
  func.func @transform_3(%arg0: i32) -> (i32, i32) {
    %c0_i32 = arith.constant 0 : i32
    %c0_i32_0 = arith.constant 0 : i32
    return %arg0, %c0_i32 : i32, i32
  }
}

</mosaic_0001>

<bundles_post_ra>
// kernel: vae_generator_forward.1
= control target key start
LH: loop header
LB: loop body
LE: loop exit
PB: predicated region body
PF: predicated region fallthrough
CT: control target
= control target key end

     0   :  { %8 = vsyncpa [#allocation3], 0  ;;  %s175_s12 = smov [#allocation2]   ;;  %s211_s0 = inlined_call_operand.vmem [shape: f32[2,32], index: 0, kind: input, shape index: {}]   ;;  %s212_s1 = inlined_call_operand.hbm [shape: f32[32,256], index: 1, kind: input, shape index: {}]   ;;  %s213_s2 = inlined_call_operand.vmem [shape: f32[1,256], index: 2, kind: input, shape index: {}]   ;;  %s214_s3 = inlined_call_operand.vmem [shape: f32[2,256], index: 3, kind: output, shape index: {}]  }
   0x1   :  { %s16_s13 = sshll.u32 %s175_s12, 4  ;;  %s17_s13 = int_to_ptr.vmem [resolvable:$true] %s16_s13 }
   0x2   :  { %s161_s14 = scalar_lea.vmem %s17_s13, 1024  ;;  %p166_p1 = scmp.lt.s32.totalorder %s17_s13, %s17_s13 }
   0x3   :  { %p162_p0 = scmp.ne.s32.totalorder %s17_s13, %s161_s14  ;;  %p167_p2 = scmp.lt.s32.totalorder %s161_s14, %s161_s14 }
   0x5   :  { %p168_p3 = por %p167_p2, %p166_p1 }
   0x7   :  { %p169_p4 = pnand %p168_p3, %p162_p0 }
   0x9   :  { %172 = shalt.err (!%p169_p4)
}
   0xa   :  { %s176_s15 = smov 256   ;;  %s177_s16 = smov 16  }
   0xb   :  { %22 = dma.hbm_to_vmem [thread:$0]  %s212_s1, 1024, %s17_s13, [#allocation3], %s176_s15, %s176_s15, %s177_s16  }
   0xc   :  { %173 = dma.done.wait [#allocation3], 1024  }
   0xd   :  { %174 = vsyncadd [#allocation3], 4294966272  ;;  %v178_v0 = vmov 0.0   ;;  %v36_v1 = vld [vmem:[#allocation2 + $0x38] sm:$0xff]  ;;  %v35_v2 = vld [vmem:[#allocation2 + $0x30] sm:$0xff]  ;;  %vm49_vm0 = vcmask 261120   ;;  %v39_v10 = vlaneseq }
   0xe   :  { %117 = vmatprep.mubr.f32.mxu0 %v178_v0  ;;  %v34_v3 = vld [vmem:[#allocation2 + $0x28] sm:$0xff]  ;;  %77 = vmatprep.subr.mxu0 %v36_v1  ;;  %v33_v4 = vld [vmem:[#allocation2 + $0x20] sm:$0xff]  ;;  %v32_v5 = vld [vmem:[#allocation2 + $0x18] sm:$0xff] }
   0xf   :  { %78 = vmatpush1.msra.mxu0 %v35_v2  ;;  %v31_v6 = vld [vmem:[#allocation2 + $0x10] sm:$0xff]  ;;  %v30_v7 = vld [vmem:[#allocation2 + $0x8] sm:$0xff]  ;;  %v29_v8 = vld [vmem:[#allocation2] sm:$0xff]  ;;  %v40_v11 = vshrl.u32 %v39_v10, 7 }
  0x10   :  { %79 = vmatprep.subr.mxu0 %v34_v3  ;;  %v28_v9 = vld [vmem:[%s211_s0] sm:$0x3] }
  0x11   :  { %80 = vmatpush1.msra.mxu0 %v33_v4  ;;  %v41_v12 = vsub.s32 0, %v40_v11  ;;  %v37_v13 = vld [vmem:[%s213_s2] sm:$0x3]  ;;  %v45_v14 = vsub.s32 1, %v40_v11 }
  0x12   :  { %81 = vmatprep.subr.mxu0 %v32_v5 }
  0x13   :  { %82 = vmatpush1.msra.mxu0 %v31_v6  ;;  %v42_v15 = vrot.slane %v37_v13, %v41_v12  ;;  %v46_v16 = vrot.slane %v37_v13, %v45_v14 }
  0x14   :  { %83 = vmatprep.subr.mxu0 %v30_v7 }
  0x15   :  { %84 = vmatpush1.msra.mxu0 %v29_v8 }
  0x16   :  { %143 = vmatmul.mubr.msk.f32.vlgmr.msra.gmra.mxu0 %vm49_vm0, %v28_v9 }
  0xd6   :  { %v119_v17 = vpop.f32.mrf.mxu0 }
  0xd7   :  { %v120_v18 = vadd.f32 %v119_v17, %v42_v15 }
  0xd8   :  { %v121_v19 = vpop.f32.mrf.mxu0 }
  0xd9   :  { %v122_v20 = vadd.f32 %v121_v19, %v46_v16  ;;  %149 = vtanh.f32 %v120_v18 }
  0xdb   :  { %151 = vtanh.f32 %v122_v20 }
  0xe6   :  { %v150_v21 = vpop.eup %149 }
  0xe8   :  { %v152_v22 = vpop.eup %151 }
  0xe9   :  { %v128_v23 = vcombine.low %v150_v21, %v152_v22 }
  0xeb   :  { %144 = vst.sshfl [vmem:[%s214_s3] sm:$0x33 pattern:$0x76325410] %v128_v23 }
  0xec   :  { %142 = vsyncpa [#allocation3], 1 }

</bundles_post_ra>
